<compile_context>
chip_gen: v5e
topology: v5e:2x2
jax: 0.10.0
libtpu: 0.0.40
codegen_flags: <defaults>
</compile_context>

<pallas_src>
import jax
import jax.numpy as jnp
from jax.experimental import pallas as pl
from jax.experimental.pallas import tpu as pltpu


def _netlin_kernel(x_ref, w_ref, o_ref):
    # x_ref: (B_blk, C_in, T)   B_blk batch elements, all channels, T lanes
    # w_ref: (C_out, C_in)      resident across the whole grid
    # o_ref: (B_blk, C_out, T)  lane-dense output block
    w = w_ref[...]
    for b in range(x_ref.shape[0]):  # static unroll over the small batch block
        o_ref[b] = jnp.dot(
            w, x_ref[b], preferred_element_type=jnp.float32
        ).astype(o_ref.dtype)


def _vmem_buffer_budget_bytes():
    """Per-generation budget for the double-buffered in+out blocks."""
    try:
        cap = pltpu.get_tpu_info().vmem_capacity_bytes
    except Exception:
        cap = 64 << 20  # conservative (v7x-class) fallback
    if cap <= (64 << 20):
        return 24 << 20  # v7x: 64 MiB physical VMEM per TC -> leave headroom
    return 48 << 20      # v5e / v6e: 128 MiB physical VMEM


def _choose_tiling(B, C_in, C_out, HW_pad, dtype_bytes, buf_budget_bytes):
    """Pick (B_blk, T).

    T: largest multiple of 128 dividing HW_pad whose double-buffered in+out
       footprint fits the budget.
    B_blk: >1 only when T == HW_pad and there is leftover budget, so each grid
       step moves one large fully contiguous HBM region.
    """
    per_lane = 2 * (C_in + C_out) * dtype_bytes  # double-buffered in+out, per lane
    n = HW_pad // 128
    T = 128
    for d in range(1, n + 1):
        if n % d == 0:
            cand = d * 128
            if cand * per_lane <= buf_budget_bytes:
                T = max(T, cand)

    B_blk = 1
    if T == HW_pad:
        max_b = max(1, buf_budget_bytes // max(1, per_lane * HW_pad))
        max_b = min(max_b, B, 8)  # cap the static unroll
        for cand in range(int(max_b), 0, -1):
            if B % cand == 0:
                B_blk = cand
                break
    return B_blk, T


def netlin_layer(x_nchw, weight):
    """Forward pass of NetLinLayer (1x1 conv, bias=False), eval semantics.

    x_nchw : (B, C_in, H, W)
    weight : (C_out, C_in) or (C_out, C_in, 1, 1)  (the conv weight)
    returns: (B, C_out, H, W), same dtype as x_nchw
    """
    if weight.ndim == 4:
        assert weight.shape[2:] == (1, 1), (
            f"expected 1x1 conv weight, got {weight.shape}")
        weight = weight.reshape(weight.shape[0], weight.shape[1])
    assert weight.ndim == 2, weight.shape

    B, C_in, H, W = x_nchw.shape
    C_out, w_cin = weight.shape
    assert w_cin == C_in, (weight.shape, x_nchw.shape)

    weight = weight.astype(x_nchw.dtype)
    dtype_bytes = jnp.dtype(x_nchw.dtype).itemsize
    HW = H * W

    # Free reshape: stays in NCHW memory order, spatial axis becomes lanes.
    x3 = x_nchw.reshape(B, C_in, HW)

    # Pad the lane axis to a multiple of 128 so all stores are lane-dense.
    HW_pad = ((HW + 127) // 128) * 128
    if HW_pad != HW:
        x3 = jnp.pad(x3, ((0, 0), (0, 0), (0, HW_pad - HW)))

    buf_budget = _vmem_buffer_budget_bytes()
    B_blk, T = _choose_tiling(B, C_in, C_out, HW_pad, dtype_bytes, buf_budget)
    grid = (B // B_blk, HW_pad // T)

    # Actual footprint: double-buffered in+out blocks + resident weight
    # + headroom for Mosaic internal scratch.
    buf_bytes = 2 * B_blk * (C_in + C_out) * T * dtype_bytes
    weight_bytes = 2 * C_out * C_in * dtype_bytes
    vmem_limit = int(max(buf_bytes + weight_bytes + (4 << 20), 8 << 20))

    cost = pl.CostEstimate(
        flops=2 * B * HW_pad * C_in * C_out,
        transcendentals=0,
        bytes_accessed=dtype_bytes
        * (B * C_in * HW_pad + C_in * C_out + B * C_out * HW_pad),
    )

    out3 = pl.pallas_call(
        _netlin_kernel,
        out_shape=jax.ShapeDtypeStruct((B, C_out, HW_pad), x_nchw.dtype),
        grid=grid,
        in_specs=[
            pl.BlockSpec((B_blk, C_in, T), lambda bb, t: (bb, 0, t)),
            pl.BlockSpec((C_out, C_in), lambda bb, t: (0, 0)),  # resident weight
        ],
        out_specs=pl.BlockSpec((B_blk, C_out, T), lambda bb, t: (bb, 0, t)),
        compiler_params=pltpu.CompilerParams(
            dimension_semantics=("parallel", "parallel"),
            vmem_limit_bytes=vmem_limit,
        ),
        cost_estimate=cost,
    )(x3, weight)

    if HW_pad != HW:
        out3 = out3[:, :, :HW]
    # Free reshape back to NCHW.
    return out3.reshape(B, C_out, H, W)


def netlin_reference(x_nchw, weight2d):
    # Pure-JAX reference: 1x1 conv == einsum over the channel axis.
    return jnp.einsum("bchw,oc->bohw", x_nchw, weight2d)


if __name__ == "__main__":
    key = jax.random.PRNGKey(0)
    kx, kw, kx2 = jax.random.split(key, 3)

    B, C_in, H, W = 2, 4, 16, 16
    C_out = 1

    x = jax.random.normal(kx, (B, C_in, H, W), dtype=jnp.float32)

    # Deterministic weight init mimicking PyTorch Conv2d default
    # (kaiming-uniform => uniform in [-1/sqrt(fan_in), 1/sqrt(fan_in)],
    #  fan_in = C_in * 1 * 1).  Stored in conv layout (C_out, C_in, 1, 1).
    bound = 1.0 / jnp.sqrt(jnp.float32(C_in))
    weight = jax.random.uniform(
        kw, (C_out, C_in, 1, 1), dtype=jnp.float32, minval=-bound, maxval=bound
    )
    weight2d = weight.reshape(C_out, C_in)

    out = jax.block_until_ready(netlin_layer(x, weight))
    ref = netlin_reference(x, weight2d)
    assert out.shape == (B, C_out, H, W), out.shape
    assert jnp.allclose(out, ref, atol=1e-5, rtol=1e-5), (
        float(jnp.max(jnp.abs(out - ref)))
    )

    # Second small check: non-128-aligned spatial size exercises the padding
    # (lane-dense store) path.
    x2 = jax.random.normal(kx2, (B, C_in, 10, 10), dtype=jnp.float32)
    out2 = jax.block_until_ready(netlin_layer(x2, weight))
    ref2 = netlin_reference(x2, weight2d)
    assert out2.shape == (B, C_out, 10, 10), out2.shape
    assert jnp.allclose(out2, ref2, atol=1e-5, rtol=1e-5), (
        float(jnp.max(jnp.abs(out2 - ref2)))
    )

    print("KERNEL_OK")
</pallas_src>

<mosaic_0001>
module attributes {stable_mosaic.version = 11 : i64} {
  func.func @_netlin_kernel(%arg0: i32, %arg1: i32, %arg2: memref<2x4x256xf32, #tpu.memory_space<vmem>>, %arg3: memref<1x4xf32, #tpu.memory_space<vmem>>, %arg4: memref<2x1x256xf32, #tpu.memory_space<vmem>>) attributes {dimension_semantics = [#tpu.dimension_semantics<parallel>, #tpu.dimension_semantics<parallel>], iteration_bounds = array<i64: 1, 1>, scalar_prefetch = 0 : i64, scratch_operands = 0 : i64, tpu.core_type = #tpu.core_type<tc>, window_params = [{transform_indices = @transform_0, window_bounds = array<i64: 2, 4, 256>}, {pipeline_mode = #tpu.pipeline_mode<synchronous>, transform_indices = @transform_1, window_bounds = array<i64: 1, 4>}, {transform_indices = @transform_2, window_bounds = array<i64: 2, 1, 256>}]} {
    %c0 = arith.constant 0 : index
    %c0_0 = arith.constant 0 : index
    %0 = vector.load %arg3[%c0, %c0_0] : memref<1x4xf32, #tpu.memory_space<vmem>>, vector<1x4xf32>
    %c0_1 = arith.constant 0 : index
    %c0_2 = arith.constant 0 : index
    %c0_3 = arith.constant 0 : index
    %1 = vector.load %arg2[%c0_1, %c0_2, %c0_3] : memref<2x4x256xf32, #tpu.memory_space<vmem>>, vector<1x4x256xf32>
    %2 = vector.shape_cast %1 : vector<1x4x256xf32> to vector<4x256xf32>
    %cst = arith.constant dense<0.000000e+00> : vector<1x256xf32>
    %3 = tpu.matmul %0, %2, %cst {dimension_numbers = #tpu.dot_dimension_numbers<[1], [0], [0], [1], [0, 0, 1, 1], [], []>} : vector<1x4xf32>, vector<4x256xf32>, vector<1x256xf32> -> vector<1x256xf32>
    %c0_4 = arith.constant 0 : index
    %c0_5 = arith.constant 0 : index
    %c0_6 = arith.constant 0 : index
    %4 = vector.load %arg4[%c0_4, %c0_5, %c0_6] : memref<2x1x256xf32, #tpu.memory_space<vmem>>, vector<1x1x256xf32>
    %5 = vector.shape_cast %4 : vector<1x1x256xf32> to vector<1x256xf32>
    %6 = vector.shape_cast %3 : vector<1x256xf32> to vector<1x1x256xf32>
    tpu.vector_store %arg4[%c0_4, %c0_5, %c0_6], %6 {strides = array<i32>} : memref<2x1x256xf32, #tpu.memory_space<vmem>>, vector<1x1x256xf32>,
    %c1 = arith.constant 1 : index
    %c0_7 = arith.constant 0 : index
    %c0_8 = arith.constant 0 : index
    %7 = vector.load %arg2[%c1, %c0_7, %c0_8] : memref<2x4x256xf32, #tpu.memory_space<vmem>>, vector<1x4x256xf32>
    %8 = vector.shape_cast %7 : vector<1x4x256xf32> to vector<4x256xf32>
    %cst_9 = arith.constant dense<0.000000e+00> : vector<1x256xf32>
    %9 = tpu.matmul %0, %8, %cst_9 {dimension_numbers = #tpu.dot_dimension_numbers<[1], [0], [0], [1], [0, 0, 1, 1], [], []>} : vector<1x4xf32>, vector<4x256xf32>, vector<1x256xf32> -> vector<1x256xf32>
    %c1_10 = arith.constant 1 : index
    %c0_11 = arith.constant 0 : index
    %c0_12 = arith.constant 0 : index
    %10 = vector.load %arg4[%c1_10, %c0_11, %c0_12] : memref<2x1x256xf32, #tpu.memory_space<vmem>>, vector<1x1x256xf32>
    %11 = vector.shape_cast %10 : vector<1x1x256xf32> to vector<1x256xf32>
    %12 = vector.shape_cast %9 : vector<1x256xf32> to vector<1x1x256xf32>
    tpu.vector_store %arg4[%c1_10, %c0_11, %c0_12], %12 {strides = array<i32>} : memref<2x1x256xf32, #tpu.memory_space<vmem>>, vector<1x1x256xf32>,
    return
  }
  func.func @transform_0(%arg0: i32, %arg1: i32) -> (i32, i32, i32) {
    %c0_i32 = arith.constant 0 : i32
    %c0_i32_0 = arith.constant 0 : i32
    return %arg0, %c0_i32, %arg1 : i32, i32, i32
  }
  func.func @transform_1(%arg0: i32, %arg1: i32) -> (i32, i32) {
    %c0_i32 = arith.constant 0 : i32
    %c0_i32_0 = arith.constant 0 : i32
    %c0_i32_1 = arith.constant 0 : i32
    return %c0_i32, %c0_i32_0 : i32, i32
  }
  func.func @transform_2(%arg0: i32, %arg1: i32) -> (i32, i32, i32) {
    %c0_i32 = arith.constant 0 : i32
    %c0_i32_0 = arith.constant 0 : i32
    return %arg0, %c0_i32, %arg1 : i32, i32, i32
  }
}

</mosaic_0001>

<bundles_post_ra>
// kernel: tpu_custom_call.1
= control target key start
LH: loop header
LB: loop body
LE: loop exit
PB: predicated region body
PF: predicated region fallthrough
CT: control target
= control target key end

     0   :  { %7 = vsyncpa [#allocation3], 0  ;;  %s309_s0 = inlined_call_operand.hbm [shape: f32[2,4,256], index: 0, kind: input, shape index: {}]   ;;  %s310_s1 = inlined_call_operand.hbm [shape: f32[1,4], index: 1, kind: input, shape index: {}]   ;;  %s311_s2 = inlined_call_operand.hbm [shape: f32[2,1,256], index: 2, kind: output, shape index: {}]  }
   0x1   :  { %8 = vsyncpa [#allocation6], 0 }
   0x2   :  { %9 = vsyncpa [#allocation4], 0  ;;  %s14_s11 = sshll.u32 %s309_s0, 4  ;;  %s278_s12 = smov [#allocation2]   ;;  %s15_s11 = int_to_ptr.hbm [resolvable:$true] %s14_s11 }
   0x3   :  { %s16_s13 = sshll.u32 %s278_s12, 4  ;;  %s28_s16 = sshll.u32 %s310_s1, 4  ;;  %s17_s13 = int_to_ptr.vmem [resolvable:$true] %s16_s13  ;;  %s29_s16 = int_to_ptr.hbm [resolvable:$true] %s28_s16 }
   0x4   :  { %s279_s17 = smov 128   ;;  %s280_s18 = smov 8  }
   0x5   :  { %22 = dma.hbm_to_vmem [thread:$0]  %s15_s11, 256, %s17_s13, [#allocation3], %s279_s17, %s279_s17, %s280_s18  }
   0x6   :  { %s281_s19 = smov [#allocation5]  }
   0x7   :  { %s30_s20 = sshll.u32 %s281_s19, 4  ;;  %s31_s20 = int_to_ptr.vmem [resolvable:$true] %s30_s20 }
   0x8   :  { %33 = dma.hbm_to_vmem [thread:$0]  %s29_s16, 16, %s31_s20, [#allocation6]  }
   0x9   :  { %272 = dma.done.wait [#allocation3], 256  }
   0xa   :  { %273 = vsyncadd [#allocation3], 4294967040 }
   0xb   :  { %274 = dma.done.wait [#allocation6], 16  }
   0xc   :  { %275 = vsyncadd [#allocation6], 4294967280  ;;  %v43_v0 = vld [vmem:[#allocation2] sm:$0xff]  ;;  %v109_v1 = vld [vmem:[#allocation2 + $0x8] sm:$0xff]  ;;  %vm52_vm0 = vcmask 1043456   ;;  %vm48_vm1 = vcmask 31744   ;;  %v103_v7 = vlaneseq }
   0xd   :  { %45 = vst [vmem:[#allocation1] ss:$2 sm:$0xff] %v43_v0  ;;  %v42_v4 = vld [vmem:[#allocation5] sm:$0x1]  ;;  %vm100_vm2 = vcmask 1040384   ;;  %s282_s0 = smov [#allocation7]  }
   0xe   :  { %vm105_vm3 = vcmp.lt.s32.totalorder %v103_v7, 256  ;;  %s169_s1 = sshll.u32 %s282_s0, 4  ;;  %s171_s23 = sshll.u32 %s311_s2, 4  ;;  %s170_s1 = int_to_ptr.vmem [resolvable:$true] %s169_s1  ;;  %s172_s23 = int_to_ptr.hbm [resolvable:$true] %s171_s23 }
   0xf   :  { %s283_s24 = smov 32   ;;  %s284_s25 = smov 2  }
  0x14   :  { %v46_v2 = vld.sshfl [vmem:[#allocation1] sm:$0xff pattern:$0x75316420]  ;;  %v47_v3 = vld.sshfl [vmem:[#allocation1 + $0x8] sm:$0xff pattern:$0x75316420] }
  0x15   :  { %111 = vst [vmem:[#allocation1] ss:$2 sm:$0xff] %v109_v1  ;;  %187 = vmatpush.msk.msra.mxu1 %vm52_vm0, %v47_v3  ;;  %185 = vmatpush.msk.msra.mxu0 %vm52_vm0, %v46_v2 }
  0x16   :  { %188 = vmatmul.msk.f32.vlgmr.msra.gmra.mxu1 %vm48_vm1, %v42_v4  ;;  %186 = vmatmul.msk.f32.vlgmr.msra.gmra.mxu0 %vm48_vm1, %v42_v4 }
  0x1c   :  { %v113_v5 = vld.sshfl [vmem:[#allocation1 + $0x8] sm:$0xff pattern:$0x75316420]  ;;  %v112_v6 = vld.sshfl [vmem:[#allocation1] sm:$0xff pattern:$0x75316420] }
  0x1d   :  { %191 = vmatpush.msk.msra.mxu3 %vm52_vm0, %v113_v5  ;;  %189 = vmatpush.msk.msra.mxu2 %vm52_vm0, %v112_v6 }
  0x1e   :  { %192 = vmatmul.msk.f32.vlgmr.msra.gmra.mxu3 %vm48_vm1, %v42_v4  ;;  %190 = vmatmul.msk.f32.vlgmr.msra.gmra.mxu2 %vm48_vm1, %v42_v4 }
  0x93   :  { %v94_v8 = vpop.f32.mrf.mxu1  ;;  %v74_v9 = vpop.f32.mrf.mxu0 }
  0x94   :  { %v99_v10 = vrot.slane %v94_v8, 7 }
  0x96   :  { %v101_v11 = vsel %vm100_vm2, %v74_v9, %v99_v10 }
  0x97   :  { %107 = vst.msk [vmem:[#allocation7] sm:$0x3] %vm105_vm3, %v101_v11 }
  0xa1   :  { %v155_v12 = vpop.f32.mrf.mxu3  ;;  %v135_v13 = vpop.f32.mrf.mxu2 }
  0xa2   :  { %v160_v14 = vrot.slane %v155_v12, 7 }
  0xa4   :  { %v161_v15 = vsel %vm100_vm2, %v135_v13, %v160_v14 }
  0xa5   :  { %164 = vst.msk [vmem:[#allocation7 + $0x2] sm:$0x3] %vm105_vm3, %v161_v15 }
  0xa6   :  { %177 = dma.vmem_to_hbm [thread:$0]  %s170_s1, 64, %s172_s23, [#allocation4], %s283_s24, %s283_s24, %s284_s25  }
  0xa7   :  { %276 = dma.done.wait [#allocation4], 64  }
  0xa8   :  { %277 = vsyncadd [#allocation4], 4294967232 }
  0xa9   :  { %182 = vsyncpa [#allocation3], 1 }
  0xaa   :  { %183 = vsyncpa [#allocation6], 1 }
  0xab   :  { %184 = vsyncpa [#allocation4], 1 }

</bundles_post_ra>
